<compile_context>
chip_gen: v7x
topology: tpu7x:2x2x1
jax: 0.10.0
libtpu: 0.0.40
codegen_flags: <defaults>
</compile_context>

<pallas_src>
import math
from functools import partial

import jax
import jax.numpy as jnp
from jax.experimental import pallas as pl
from jax.experimental.pallas import tpu as pltpu


def _full_attention_l1_kernel(q_ref, k_ref, v_ref, denom_ref, w_add_ref, o_ref,
                              *, scale, H, E, D):
    # q_ref: (L, H*E), k_ref: (S, H*E), v_ref: (S, H*D)
    # denom_ref: (L, 1)  = 1 + rowsum(softplus(W1))
    # w_add_ref: (L, S)  = softplus(W1)/denom + softmax(W2, dim=-1)
    # o_ref:     (L, H*D)
    denom = denom_ref[...]            # (L, 1) f32
    w_add = w_add_ref[...]            # (L, S) f32

    outs = []
    for h in range(H):                # static unroll over heads (H is small)
        q_h = q_ref[:, h * E:(h + 1) * E]          # (L, E) native dtype
        k_h = k_ref[:, h * E:(h + 1) * E]          # (S, E)
        v_h = v_ref[:, h * D:(h + 1) * D]          # (S, D)

        # scores = q_h @ k_h^T on the MXU (native dtype operands, f32 accumulate)
        s = jax.lax.dot_general(
            q_h, k_h, (((1,), (1,)), ((), ())),
            preferred_element_type=jnp.float32) * scale

        # numerically-stable softmax numerator; the softmax divide and the L1
        # normalize are fused into one approximate reciprocal (EUP slot):
        #   softmax(s)/denom = e / (rowsum(e) * denom)
        m = jnp.max(s, axis=-1, keepdims=True)
        e = jnp.exp(s - m)
        inv = pl.reciprocal(jnp.sum(e, axis=-1, keepdims=True) * denom,
                            approx=True)
        a = e * inv + w_add                        # (L, S) f32

        # dropout is identity in eval mode; no RNG applied here.
        outs.append(jnp.dot(a.astype(v_h.dtype), v_h,
                            preferred_element_type=jnp.float32))

    # single lane-dense store of the (L, H*D) slab
    o_ref[...] = jnp.concatenate(outs, axis=-1).astype(o_ref.dtype)


def full_attention_l1(queries, keys, values, weight_mat, weight_mat2, scale=None):
    """queries (B,L,H,E), keys (B,S,H,E), values (B,S,H,D),
    weight_mat / weight_mat2 (1,1,L,S).  Returns V with shape (B, L, H, D)."""
    B, L, H, E = queries.shape
    _, S, _, D = values.shape
    scale = scale if scale is not None else 1.0 / math.sqrt(E)

    # ---- hoisted, (b,h)-independent weight math (computed once) ----
    w1 = weight_mat[0, 0].astype(jnp.float32)            # (L, S)
    w2 = weight_mat2[0, 0].astype(jnp.float32)           # (L, S)
    sp = jax.nn.softplus(w1)
    denom = 1.0 + jnp.sum(sp, axis=-1, keepdims=True)    # (L, 1); softmax rows sum to 1
    w_add = sp / denom + jax.nn.softmax(w2, axis=-1)     # (L, S)

    # ---- free contiguous reshapes: original layouts, no HBM transposes ----
    q = queries.reshape(B, L, H * E)
    k = keys.reshape(B, S, H * E)
    v = values.reshape(B, S, H * D)

    # TODO(synk): for large L/S add an S-reduction ("arbitrary") grid axis with
    # online-softmax accumulators (flash pattern) so the (L,S) tiles fit v7x's
    # 64 MiB VMEM; unnecessary at these shapes.
    out = pl.pallas_call(
        partial(_full_attention_l1_kernel, scale=scale, H=H, E=E, D=D),
        out_shape=jax.ShapeDtypeStruct((B, L, H * D), queries.dtype),
        grid_spec=pltpu.PrefetchScalarGridSpec(
            num_scalar_prefetch=0,
            grid=(B,),
            in_specs=[
                pl.BlockSpec((None, L, H * E), lambda b: (b, 0, 0)),
                pl.BlockSpec((None, S, H * E), lambda b: (b, 0, 0)),
                pl.BlockSpec((None, S, H * D), lambda b: (b, 0, 0)),
                pl.BlockSpec((L, 1), lambda b: (0, 0)),   # denom (grid-constant)
                pl.BlockSpec((L, S), lambda b: (0, 0)),   # w_add (grid-constant)
            ],
            out_specs=pl.BlockSpec((None, L, H * D), lambda b: (b, 0, 0)),
        ),
        compiler_params=pltpu.CompilerParams(
            dimension_semantics=("parallel",),
        ),
    )(q, k, v, denom, w_add)

    return out.reshape(B, L, H, D)


if __name__ == "__main__":
    key = jax.random.PRNGKey(0)
    B, L, H, E = 2, 8, 4, 32
    S, D = L, E
    token_num = L  # weight_mat / weight_mat2 are (token_num, token_num); token_num == L == S

    kq, kk, kv, kw1, kw2 = jax.random.split(key, 5)
    queries = jax.random.normal(kq, (B, L, H, E), dtype=jnp.float32)
    keys_ = jax.random.normal(kk, (B, S, H, E), dtype=jnp.float32)
    values = jax.random.normal(kv, (B, S, H, D), dtype=jnp.float32)

    # init_weight_mat = eye(token_num)*1.0 + randn(token_num, token_num)*1.0
    weight_mat = (
        jnp.eye(token_num, dtype=jnp.float32)
        + jax.random.normal(kw1, (token_num, token_num), dtype=jnp.float32)
    )[None, None, :, :]
    weight_mat2 = jax.random.normal(kw2, (1, 1, token_num, token_num), dtype=jnp.float32)

    out = full_attention_l1(queries, keys_, values, weight_mat, weight_mat2)
    out = jax.block_until_ready(out)

    # Pure-JAX reference of FullAttention_L1.forward (mask_flag=False, eval mode).
    scale = 1.0 / math.sqrt(E)
    scores = jnp.einsum("blhe,bshe->bhls", queries, keys_)
    A = jax.nn.softmax(scale * scores, axis=-1) + jax.nn.softplus(weight_mat)
    A = A / jnp.maximum(jnp.sum(jnp.abs(A), axis=-1, keepdims=True), 1e-12)
    ref = jnp.einsum("bhls,bshd->blhd", A + jax.nn.softmax(weight_mat2, axis=-1), values)

    assert out.shape == (B, L, H, D)
    # slightly relaxed tolerance: pl.reciprocal(approx=True) is an approximate EUP op
    assert jnp.allclose(out, ref, atol=2e-3, rtol=2e-3), float(jnp.max(jnp.abs(out - ref)))
    print("KERNEL_OK")
</pallas_src>

<mosaic_0001>
module attributes {stable_mosaic.version = 11 : i64} {
  func.func @_full_attention_l1_kernel(%arg0: i32, %arg1: memref<1x8x128xf32, #tpu.memory_space<vmem>>, %arg2: memref<1x8x128xf32, #tpu.memory_space<vmem>>, %arg3: memref<1x8x128xf32, #tpu.memory_space<vmem>>, %arg4: memref<8x1xf32, #tpu.memory_space<vmem>>, %arg5: memref<8x8xf32, #tpu.memory_space<vmem>>, %arg6: memref<1x8x128xf32, #tpu.memory_space<vmem>>) attributes {dimension_semantics = [#tpu.dimension_semantics<parallel>], iteration_bounds = array<i64: 2>, scalar_prefetch = 0 : i64, scratch_operands = 0 : i64, tpu.core_type = #tpu.core_type<tc>, window_params = [{transform_indices = @transform_0, window_bounds = array<i64: 1, 8, 128>}, {transform_indices = @transform_1, window_bounds = array<i64: 1, 8, 128>}, {transform_indices = @transform_2, window_bounds = array<i64: 1, 8, 128>}, {pipeline_mode = #tpu.pipeline_mode<synchronous>, transform_indices = @transform_3, window_bounds = array<i64: 8, 1>}, {pipeline_mode = #tpu.pipeline_mode<synchronous>, transform_indices = @transform_4, window_bounds = array<i64: 8, 8>}, {transform_indices = @transform_5, window_bounds = array<i64: 1, 8, 128>}]} {
    %c0 = arith.constant 0 : index
    %c0_0 = arith.constant 0 : index
    %0 = vector.load %arg4[%c0, %c0_0] : memref<8x1xf32, #tpu.memory_space<vmem>>, vector<8x1xf32>
    %c0_1 = arith.constant 0 : index
    %c0_2 = arith.constant 0 : index
    %1 = vector.load %arg5[%c0_1, %c0_2] : memref<8x8xf32, #tpu.memory_space<vmem>>, vector<8x8xf32>
    %c0_3 = arith.constant 0 : index
    %c0_4 = arith.constant 0 : index
    %c0_5 = arith.constant 0 : index
    %2 = vector.load %arg1[%c0_3, %c0_4, %c0_5] : memref<1x8x128xf32, #tpu.memory_space<vmem>>, vector<1x8x32xf32>
    %3 = vector.shape_cast %2 : vector<1x8x32xf32> to vector<8x32xf32>
    %c0_6 = arith.constant 0 : index
    %c0_7 = arith.constant 0 : index
    %c0_8 = arith.constant 0 : index
    %4 = vector.load %arg2[%c0_6, %c0_7, %c0_8] : memref<1x8x128xf32, #tpu.memory_space<vmem>>, vector<1x8x32xf32>
    %5 = vector.shape_cast %4 : vector<1x8x32xf32> to vector<8x32xf32>
    %c0_9 = arith.constant 0 : index
    %c0_10 = arith.constant 0 : index
    %c0_11 = arith.constant 0 : index
    %6 = vector.load %arg3[%c0_9, %c0_10, %c0_11] : memref<1x8x128xf32, #tpu.memory_space<vmem>>, vector<1x8x32xf32>
    %7 = vector.shape_cast %6 : vector<1x8x32xf32> to vector<8x32xf32>
    %cst = arith.constant dense<0.000000e+00> : vector<8x8xf32>
    %8 = tpu.matmul %3, %5, %cst {dimension_numbers = #tpu.dot_dimension_numbers<[1], [1], [0], [0], [0, 0, 1, 0], [], []>} : vector<8x32xf32>, vector<8x32xf32>, vector<8x8xf32> -> vector<8x8xf32>
    %cst_12 = arith.constant 0.176776692 : f32
    %9 = vector.broadcast %cst_12 : f32 to vector<8x8xf32>
    %10 = arith.mulf %8, %9 : vector<8x8xf32>
    %cst_13 = arith.constant dense<0xFF800000> : vector<8xf32>
    %11 = vector.multi_reduction <maximumf>, %10, %cst_13 [1] : vector<8x8xf32> to vector<8xf32>
    %12 = vector.shape_cast %11 : vector<8xf32> to vector<8x1xf32>
    %13 = vector.broadcast %12 : vector<8x1xf32> to vector<8x8xf32>
    %14 = arith.subf %10, %13 : vector<8x8xf32>
    %15 = math.exp %14 : vector<8x8xf32>
    %cst_14 = arith.constant dense<0.000000e+00> : vector<8xf32>
    %16 = vector.multi_reduction <add>, %15, %cst_14 [1] : vector<8x8xf32> to vector<8xf32>
    %17 = vector.shape_cast %16 : vector<8xf32> to vector<8x1xf32>
    %18 = arith.mulf %17, %0 : vector<8x1xf32>
    %19 = tpu.reciprocal %18 {approx = true} : vector<8x1xf32> -> vector<8x1xf32>
    %20 = vector.broadcast %19 : vector<8x1xf32> to vector<8x8xf32>
    %21 = arith.mulf %15, %20 : vector<8x8xf32>
    %22 = arith.addf %21, %1 : vector<8x8xf32>
    %cst_15 = arith.constant dense<0.000000e+00> : vector<8x32xf32>
    %23 = tpu.matmul %22, %7, %cst_15 {dimension_numbers = #tpu.dot_dimension_numbers<[1], [0], [0], [1], [0, 0, 1, 1], [], []>} : vector<8x8xf32>, vector<8x32xf32>, vector<8x32xf32> -> vector<8x32xf32>
    %c0_16 = arith.constant 0 : index
    %c0_17 = arith.constant 0 : index
    %c32 = arith.constant 32 : index
    %24 = vector.load %arg1[%c0_16, %c0_17, %c32] : memref<1x8x128xf32, #tpu.memory_space<vmem>>, vector<1x8x32xf32>
    %25 = vector.shape_cast %24 : vector<1x8x32xf32> to vector<8x32xf32>
    %c0_18 = arith.constant 0 : index
    %c0_19 = arith.constant 0 : index
    %c32_20 = arith.constant 32 : index
    %26 = vector.load %arg2[%c0_18, %c0_19, %c32_20] : memref<1x8x128xf32, #tpu.memory_space<vmem>>, vector<1x8x32xf32>
    %27 = vector.shape_cast %26 : vector<1x8x32xf32> to vector<8x32xf32>
    %c0_21 = arith.constant 0 : index
    %c0_22 = arith.constant 0 : index
    %c32_23 = arith.constant 32 : index
    %28 = vector.load %arg3[%c0_21, %c0_22, %c32_23] : memref<1x8x128xf32, #tpu.memory_space<vmem>>, vector<1x8x32xf32>
    %29 = vector.shape_cast %28 : vector<1x8x32xf32> to vector<8x32xf32>
    %cst_24 = arith.constant dense<0.000000e+00> : vector<8x8xf32>
    %30 = tpu.matmul %25, %27, %cst_24 {dimension_numbers = #tpu.dot_dimension_numbers<[1], [1], [0], [0], [0, 0, 1, 0], [], []>} : vector<8x32xf32>, vector<8x32xf32>, vector<8x8xf32> -> vector<8x8xf32>
    %cst_25 = arith.constant 0.176776692 : f32
    %31 = vector.broadcast %cst_25 : f32 to vector<8x8xf32>
    %32 = arith.mulf %30, %31 : vector<8x8xf32>
    %cst_26 = arith.constant dense<0xFF800000> : vector<8xf32>
    %33 = vector.multi_reduction <maximumf>, %32, %cst_26 [1] : vector<8x8xf32> to vector<8xf32>
    %34 = vector.shape_cast %33 : vector<8xf32> to vector<8x1xf32>
    %35 = vector.broadcast %34 : vector<8x1xf32> to vector<8x8xf32>
    %36 = arith.subf %32, %35 : vector<8x8xf32>
    %37 = math.exp %36 : vector<8x8xf32>
    %cst_27 = arith.constant dense<0.000000e+00> : vector<8xf32>
    %38 = vector.multi_reduction <add>, %37, %cst_27 [1] : vector<8x8xf32> to vector<8xf32>
    %39 = vector.shape_cast %38 : vector<8xf32> to vector<8x1xf32>
    %40 = arith.mulf %39, %0 : vector<8x1xf32>
    %41 = tpu.reciprocal %40 {approx = true} : vector<8x1xf32> -> vector<8x1xf32>
    %42 = vector.broadcast %41 : vector<8x1xf32> to vector<8x8xf32>
    %43 = arith.mulf %37, %42 : vector<8x8xf32>
    %44 = arith.addf %43, %1 : vector<8x8xf32>
    %cst_28 = arith.constant dense<0.000000e+00> : vector<8x32xf32>
    %45 = tpu.matmul %44, %29, %cst_28 {dimension_numbers = #tpu.dot_dimension_numbers<[1], [0], [0], [1], [0, 0, 1, 1], [], []>} : vector<8x8xf32>, vector<8x32xf32>, vector<8x32xf32> -> vector<8x32xf32>
    %c0_29 = arith.constant 0 : index
    %c0_30 = arith.constant 0 : index
    %c64 = arith.constant 64 : index
    %46 = vector.load %arg1[%c0_29, %c0_30, %c64] : memref<1x8x128xf32, #tpu.memory_space<vmem>>, vector<1x8x32xf32>
    %47 = vector.shape_cast %46 : vector<1x8x32xf32> to vector<8x32xf32>
    %c0_31 = arith.constant 0 : index
    %c0_32 = arith.constant 0 : index
    %c64_33 = arith.constant 64 : index
    %48 = vector.load %arg2[%c0_31, %c0_32, %c64_33] : memref<1x8x128xf32, #tpu.memory_space<vmem>>, vector<1x8x32xf32>
    %49 = vector.shape_cast %48 : vector<1x8x32xf32> to vector<8x32xf32>
    %c0_34 = arith.constant 0 : index
    %c0_35 = arith.constant 0 : index
    %c64_36 = arith.constant 64 : index
    %50 = vector.load %arg3[%c0_34, %c0_35, %c64_36] : memref<1x8x128xf32, #tpu.memory_space<vmem>>, vector<1x8x32xf32>
    %51 = vector.shape_cast %50 : vector<1x8x32xf32> to vector<8x32xf32>
    %cst_37 = arith.constant dense<0.000000e+00> : vector<8x8xf32>
    %52 = tpu.matmul %47, %49, %cst_37 {dimension_numbers = #tpu.dot_dimension_numbers<[1], [1], [0], [0], [0, 0, 1, 0], [], []>} : vector<8x32xf32>, vector<8x32xf32>, vector<8x8xf32> -> vector<8x8xf32>
    %cst_38 = arith.constant 0.176776692 : f32
    %53 = vector.broadcast %cst_38 : f32 to vector<8x8xf32>
    %54 = arith.mulf %52, %53 : vector<8x8xf32>
    %cst_39 = arith.constant dense<0xFF800000> : vector<8xf32>
    %55 = vector.multi_reduction <maximumf>, %54, %cst_39 [1] : vector<8x8xf32> to vector<8xf32>
    %56 = vector.shape_cast %55 : vector<8xf32> to vector<8x1xf32>
    %57 = vector.broadcast %56 : vector<8x1xf32> to vector<8x8xf32>
    %58 = arith.subf %54, %57 : vector<8x8xf32>
    %59 = math.exp %58 : vector<8x8xf32>
    %cst_40 = arith.constant dense<0.000000e+00> : vector<8xf32>
    %60 = vector.multi_reduction <add>, %59, %cst_40 [1] : vector<8x8xf32> to vector<8xf32>
    %61 = vector.shape_cast %60 : vector<8xf32> to vector<8x1xf32>
    %62 = arith.mulf %61, %0 : vector<8x1xf32>
    %63 = tpu.reciprocal %62 {approx = true} : vector<8x1xf32> -> vector<8x1xf32>
    %64 = vector.broadcast %63 : vector<8x1xf32> to vector<8x8xf32>
    %65 = arith.mulf %59, %64 : vector<8x8xf32>
    %66 = arith.addf %65, %1 : vector<8x8xf32>
    %cst_41 = arith.constant dense<0.000000e+00> : vector<8x32xf32>
    %67 = tpu.matmul %66, %51, %cst_41 {dimension_numbers = #tpu.dot_dimension_numbers<[1], [0], [0], [1], [0, 0, 1, 1], [], []>} : vector<8x8xf32>, vector<8x32xf32>, vector<8x32xf32> -> vector<8x32xf32>
    %c0_42 = arith.constant 0 : index
    %c0_43 = arith.constant 0 : index
    %c96 = arith.constant 96 : index
    %68 = vector.load %arg1[%c0_42, %c0_43, %c96] : memref<1x8x128xf32, #tpu.memory_space<vmem>>, vector<1x8x32xf32>
    %69 = vector.shape_cast %68 : vector<1x8x32xf32> to vector<8x32xf32>
    %c0_44 = arith.constant 0 : index
    %c0_45 = arith.constant 0 : index
    %c96_46 = arith.constant 96 : index
    %70 = vector.load %arg2[%c0_44, %c0_45, %c96_46] : memref<1x8x128xf32, #tpu.memory_space<vmem>>, vector<1x8x32xf32>
    %71 = vector.shape_cast %70 : vector<1x8x32xf32> to vector<8x32xf32>
    %c0_47 = arith.constant 0 : index
    %c0_48 = arith.constant 0 : index
    %c96_49 = arith.constant 96 : index
    %72 = vector.load %arg3[%c0_47, %c0_48, %c96_49] : memref<1x8x128xf32, #tpu.memory_space<vmem>>, vector<1x8x32xf32>
    %73 = vector.shape_cast %72 : vector<1x8x32xf32> to vector<8x32xf32>
    %cst_50 = arith.constant dense<0.000000e+00> : vector<8x8xf32>
    %74 = tpu.matmul %69, %71, %cst_50 {dimension_numbers = #tpu.dot_dimension_numbers<[1], [1], [0], [0], [0, 0, 1, 0], [], []>} : vector<8x32xf32>, vector<8x32xf32>, vector<8x8xf32> -> vector<8x8xf32>
    %cst_51 = arith.constant 0.176776692 : f32
    %75 = vector.broadcast %cst_51 : f32 to vector<8x8xf32>
    %76 = arith.mulf %74, %75 : vector<8x8xf32>
    %cst_52 = arith.constant dense<0xFF800000> : vector<8xf32>
    %77 = vector.multi_reduction <maximumf>, %76, %cst_52 [1] : vector<8x8xf32> to vector<8xf32>
    %78 = vector.shape_cast %77 : vector<8xf32> to vector<8x1xf32>
    %79 = vector.broadcast %78 : vector<8x1xf32> to vector<8x8xf32>
    %80 = arith.subf %76, %79 : vector<8x8xf32>
    %81 = math.exp %80 : vector<8x8xf32>
    %cst_53 = arith.constant dense<0.000000e+00> : vector<8xf32>
    %82 = vector.multi_reduction <add>, %81, %cst_53 [1] : vector<8x8xf32> to vector<8xf32>
    %83 = vector.shape_cast %82 : vector<8xf32> to vector<8x1xf32>
    %84 = arith.mulf %83, %0 : vector<8x1xf32>
    %85 = tpu.reciprocal %84 {approx = true} : vector<8x1xf32> -> vector<8x1xf32>
    %86 = vector.broadcast %85 : vector<8x1xf32> to vector<8x8xf32>
    %87 = arith.mulf %81, %86 : vector<8x8xf32>
    %88 = arith.addf %87, %1 : vector<8x8xf32>
    %cst_54 = arith.constant dense<0.000000e+00> : vector<8x32xf32>
    %89 = tpu.matmul %88, %73, %cst_54 {dimension_numbers = #tpu.dot_dimension_numbers<[1], [0], [0], [1], [0, 0, 1, 1], [], []>} : vector<8x8xf32>, vector<8x32xf32>, vector<8x32xf32> -> vector<8x32xf32>
    %90 = tpu.concatenate %23, %45, %67, %89 in 1 : vector<8x32xf32>, vector<8x32xf32>, vector<8x32xf32>, vector<8x32xf32> -> vector<8x128xf32>
    %c0_55 = arith.constant 0 : index
    %c0_56 = arith.constant 0 : index
    %c0_57 = arith.constant 0 : index
    %91 = vector.load %arg6[%c0_55, %c0_56, %c0_57] : memref<1x8x128xf32, #tpu.memory_space<vmem>>, vector<1x8x128xf32>
    %92 = vector.shape_cast %91 : vector<1x8x128xf32> to vector<8x128xf32>
    %93 = vector.shape_cast %90 : vector<8x128xf32> to vector<1x8x128xf32>
    tpu.vector_store %arg6[%c0_55, %c0_56, %c0_57], %93 {strides = array<i32>} : memref<1x8x128xf32, #tpu.memory_space<vmem>>, vector<1x8x128xf32>,
    return
  }
  func.func @transform_0(%arg0: i32) -> (i32, i32, i32) {
    %c0_i32 = arith.constant 0 : i32
    %c0_i32_0 = arith.constant 0 : i32
    %c0_i32_1 = arith.constant 0 : i32
    return %arg0, %c0_i32, %c0_i32_0 : i32, i32, i32
  }
  func.func @transform_1(%arg0: i32) -> (i32, i32, i32) {
    %c0_i32 = arith.constant 0 : i32
    %c0_i32_0 = arith.constant 0 : i32
    %c0_i32_1 = arith.constant 0 : i32
    return %arg0, %c0_i32, %c0_i32_0 : i32, i32, i32
  }
  func.func @transform_2(%arg0: i32) -> (i32, i32, i32) {
    %c0_i32 = arith.constant 0 : i32
    %c0_i32_0 = arith.constant 0 : i32
    %c0_i32_1 = arith.constant 0 : i32
    return %arg0, %c0_i32, %c0_i32_0 : i32, i32, i32
  }
  func.func @transform_3(%arg0: i32) -> (i32, i32) {
    %c0_i32 = arith.constant 0 : i32
    %c0_i32_0 = arith.constant 0 : i32
    %c0_i32_1 = arith.constant 0 : i32
    return %c0_i32, %c0_i32_0 : i32, i32
  }
  func.func @transform_4(%arg0: i32) -> (i32, i32) {
    %c0_i32 = arith.constant 0 : i32
    %c0_i32_0 = arith.constant 0 : i32
    %c0_i32_1 = arith.constant 0 : i32
    return %c0_i32, %c0_i32_0 : i32, i32
  }
  func.func @transform_5(%arg0: i32) -> (i32, i32, i32) {
    %c0_i32 = arith.constant 0 : i32
    %c0_i32_0 = arith.constant 0 : i32
    %c0_i32_1 = arith.constant 0 : i32
    return %arg0, %c0_i32, %c0_i32_0 : i32, i32, i32
  }
}

</mosaic_0001>

<bundles_post_ra>
// kernel: tpu_custom_call.1
= control target key start
LH: loop header
LB: loop body
LE: loop exit
PB: predicated region body
PF: predicated region fallthrough
CT: control target
= control target key end

     0   :  { %10 = vsyncpa [#allocation3], 0  ;;  %s1759_s0 = inlined_call_operand.hbm [shape: f32[2,8,128], index: 0, kind: input, shape index: {}]   ;;  %s1760_s1 = inlined_call_operand.hbm [shape: f32[2,8,128], index: 1, kind: input, shape index: {}]   ;;  %s1761_s2 = inlined_call_operand.vmem [shape: f32[2,8,128], index: 2, kind: input, shape index: {}]   ;;  %s1762_s3 = inlined_call_operand.vmem [shape: f32[8,1], index: 3, kind: input, shape index: {}]   ;;  %s1763_s4 = inlined_call_operand.vmem [shape: f32[8,8], index: 4, kind: input, shape index: {}]   ;;  %s1764_s5 = inlined_call_operand.hbm [shape: f32[2,8,128], index: 5, kind: output, shape index: {}]  }
   0x1   :  { %12 = vsyncpa [#allocation3 + $0x1], 0 }
   0x2   :  { %13 = vsyncpa [#allocation6], 0 }
   0x3   :  { %15 = vsyncpa [#allocation6 + $0x1], 0 }
   0x4   :  { %16 = vsyncpa [#allocation4], 0 }
   0x5   :  { %18 = vsyncpa [#allocation4 + $0x1], 0  ;;  %s1456_s18 = smov 0   ;;  %s1458_s19 = smov 0  }
   0x6   :  { %s1460_s20 = smov 0   ;;  %s1462_s21 = smov 0  }
   0x7 LB: > { %s1477_s22 = sadd.s32 4294967295, %s1415_s21   ;;  %s1126_s23 = sadd.s32 4294967294, %s1415_s21   ;;  %s1415_s21 = sphi %s1462_s21, %s1783_s21   ;;  %s1411_s20 = sphi %s1460_s20, %s1782_s20   ;;  %s1407_s19 = sphi %s1458_s19, %s1781_s19   ;;  %s1403_s18 = sphi %s1456_s18, %s1780_s18  }
   0x8   : > { %s1481_s24 = sadd.s32 1, %s1415_s21   ;;  %s31_s25 = sadd.s32 1, %s1411_s20 }
   0x9   : > { %s28_s26 = ssub.s32 %s1415_s21, %s1481_s24  ;;  %p38_p0 = scmp.ne.s32.totalorder %s1411_s20, %s1407_s19 }
   0xa   : > { %p29_p1 = scmp.eq.s32.totalorder %s28_s26, 0  ;;  %p39_p2 = scmp.eq.s32.totalorder %s1415_s21, 0 }
   0xb   : > { %p44_p3 = scmp.ne.s32.totalorder %s1407_s19, %s1403_s18  ;;  %p45_p4 = scmp.eq.s32.totalorder %s1477_s22, 0 }
   0xc   : > { %s1493_s27 = scalar_select %p29_p1, %s1411_s20, %s31_s25  }
   0xd   : > { %p1495_p5 = por %p39_p2, %p38_p0  ;;  %p1499_p6 = por %p45_p4, %p44_p3 }
   0xe   : > { %p162_p7 = scmp.eq.s32.totalorder %s1477_s22, 1  ;;  %p168_p8 = scmp.eq.s32.totalorder %s1126_s23, 1 }
   0xf   : > { %s1768_s29 = scalar_select %p1499_p6, 1, 0 }
  0x10   : > { %p1227_p10 = scmp.lt.s32.totalorder %s1415_s21, 2  ;;  %p1506_p11 = por %p162_p7, %p38_p0 }
  0x11   : > { %p1510_p12 = por %p168_p8, %p44_p3  ;;  %s1515_s7 = sand.u32 1, %s1411_s20  }
  0x12   : > { %s1769_s30 = scalar_select %p1506_p11, 1, 0 }
  0x13   : > { %s1770_s6 = scalar_select %p1510_p12, 1, 0 }
  0x14   : > { %s1130_s8 = sshll.u32 %s1415_s21, 7  ;;  %s1129_s9 = sshll.u32 %s1515_s7, 3 }
  0x15   : > { %s1524_s12 = scalar_lea.hbm %s1759_s0, %s1130_s8  ;;  %s198_s13 = scalar_lea.vmem [#allocation2], %s1129_s9 }
  0x16   : > { %s205_s14 = sshll.u32 %s198_s13, 4  ;;  %p1530_p13 = pnand %p1227_p10, %p1495_p5  ;;  %s1534_s14 = int_to_ptr.vmem [resolvable:$true] %s205_s14 }
  0x17   : > { %s195_s16 = scalar_lea.sflag [#allocation3], %s1515_s7  ;;  %s1285_s17 = scalar_lea.hbm %s1524_s12, 128 }
  0x18   : > { %p1286_p2 = scmp.ne.s32.totalorder %s1524_s12, %s1285_s17  ;;  %p1287_p3 = pneg %p1530_p13 }
  0x19   : > { %s1290_s26 = scalar_lea.hbm %s1759_s0, 256  ;;  %p1291_p5 = scmp.lt.u32.totalorder %s1524_s12, %s1759_s0 }
  0x1a   : > { %p1288_p4 = pnand %p1287_p3, %p1286_p2  ;;  %p1292_p8 = scmp.lt.u32.totalorder %s1290_s26, %s1285_s17 }
  0x1b   : > { %p1294_p9 = scmp.lt.u32.totalorder %s1285_s17, %s1524_s12 }
  0x1c   : > { %p1289_p7 = pneg %p1288_p4  ;;  %p1293_p10 = por %p1292_p8, %p1291_p5 }
  0x1e   : > { %p1295_p0 = por %p1294_p9, %p1293_p10 }
  0x20   : > { %p1296_p1 = pnand %p1295_p0, %p1289_p7 }
  0x22   : > { %1299 = shalt.err (!%p1296_p1)
}
  0x23   : > { %s1300_s11 = scalar_lea.vmem %s1534_s14, 128  ;;  %s1417_s13 = smov [#allocation2]  }
  0x24   : > { %p1301_p2 = scmp.ne.s32.totalorder %s1534_s14, %s1300_s11  ;;  %s1305_s23 = sshll.u32 %s1417_s13, 4  ;;  %s1306_s23 = int_to_ptr.vmem [resolvable:$false] %s1305_s23 }
  0x25   : > { %s1307_s25 = scalar_lea.vmem %s1306_s23, 256  ;;  %p1308_p11 = scmp.lt.s32.totalorder %s1534_s14, %s1306_s23 }
  0x26   : > { %p1303_p4 = pnand %p1301_p2, %p1287_p3  ;;  %p1309_p5 = scmp.lt.s32.totalorder %s1307_s25, %s1300_s11 }
  0x28   : > { %p1304_p12 = pneg %p1303_p4  ;;  %p1310_p8 = por %p1309_p5, %p1308_p11 }
  0x2a   : > { %p1311_p9 = pnand %p1310_p8, %p1304_p12 }
  0x2c   : > { %1314 = shalt.err (!%p1311_p9)
}
  0x2d   : > { %1219 = dma.hbm_to_vmem [thread:$0]  (!%p1530_p13), %s1524_s12, 128, %s1534_s14, %s195_s16  }
  0x2e   : > { %p1772_p0 = scmp.lt.s32.totalorder %s1415_s21, 3  ;;  %p1773_p1 = scmp.ge.s32.totalorder %s1415_s21, 1 }
  0x2f   : > { %s1577_s10 = scalar_lea.hbm %s1760_s1, %s1130_s8  ;;  %s216_s11 = scalar_lea.vmem [#allocation5], %s1129_s9 }
  0x30   : > { %p1568_p7 = pnand %p1773_p1, %p1772_p0  ;;  %s223_s13 = sshll.u32 %s216_s11, 4  ;;  %s224_s13 = int_to_ptr.vmem [resolvable:$true] %s223_s13 }
  0x31   : > { %s213_s12 = scalar_lea.sflag [#allocation6], %s1515_s7  ;;  %s1315_s14 = scalar_lea.hbm %s1577_s10, 128 }
  0x32   : > { %s1774_s17 = scalar_select %p1568_p7, 1, 0 }
  0x33   : > { %p1316_p11 = scmp.ne.s32.totalorder %s1577_s10, %s1315_s14  ;;  %s1320_s8 = scalar_lea.hbm %s1760_s1, 256 }
  0x34   : > { %p1321_p2 = scmp.lt.u32.totalorder %s1577_s10, %s1760_s1  ;;  %p1322_p4 = scmp.lt.u32.totalorder %s1320_s8, %s1315_s14 }
  0x35   : > { %p1318_p12 = pnand %p1316_p11, %p1287_p3  ;;  %p1324_p8 = scmp.lt.u32.totalorder %s1315_s14, %s1577_s10 }
  0x36   : > { %p1323_p5 = por %p1322_p4, %p1321_p2 }
  0x37   : > { %p1319_p10 = pneg %p1318_p12 }
  0x38   : > { %p1325_p9 = por %p1324_p8, %p1323_p5 }
  0x3a   : > { %p1326_p0 = pnand %p1325_p9, %p1319_p10 }
  0x3c   : > { %1329 = shalt.err (!%p1326_p0)
}
  0x3d   : > { %s1330_s7 = scalar_lea.vmem %s224_s13, 128  ;;  %s1418_s9 = smov [#allocation5]  }
  0x3e   : > { %p1331_p1 = scmp.ne.s32.totalorder %s224_s13, %s1330_s7  ;;  %s1335_s28 = sshll.u32 %s1418_s9, 4  ;;  %s1336_s28 = int_to_ptr.vmem [resolvable:$false] %s1335_s28 }
  0x3f   : > { %s1337_s11 = scalar_lea.vmem %s1336_s28, 256  ;;  %p1338_p6 = scmp.lt.s32.totalorder %s224_s13, %s1336_s28 }
  0x40   : > { %p1333_p11 = pnand %p1331_p1, %p1287_p3  ;;  %p1339_p7 = scmp.lt.s32.totalorder %s1337_s11, %s1330_s7 }
  0x42   : > { %p1334_p12 = pneg %p1333_p11  ;;  %p1340_p2 = por %p1339_p7, %p1338_p6 }
  0x44   : > { %p1341_p4 = pnand %p1340_p2, %p1334_p12 }
  0x46   : > { %1344 = shalt.err (!%p1341_p4)
}
  0x47   : > { %1222 = dma.hbm_to_vmem [thread:$0]  (!%p1530_p13), %s1577_s10, 128, %s224_s13, %s213_s12  }
  0x48   : > { %p1775_p10 = scmp.ne.s32.totalorder %s1774_s17, 0 }
  0x49   : > { %s1604_s14 = sand.u32 (!%p1775_p10), 1, %s1407_s19   ;;  %p1776_p6 = scmp.ne.s32.totalorder (!%p1775_p10), %s1768_s29, 0 }
  0x4a   : > { %239 = sbr.rel (%p1775_p10) target bundleno = 1777 (0x6f1), region = 40  ;;  %s1607_s16 = sshll.u32 (!%p1775_p10), %s1604_s14, 3 }
  0x4b   : > { %s242_s23 = scalar_lea.sflag (!%p1775_p10), [#allocation3], %s1604_s14  ;;  %s245_s8 = scalar_lea.vmem (!%p1775_p10), [#allocation2], %s1607_s16 }
  0x51   : > { %1390 = dma.done.wait (%p1776_p6), %s242_s23, 128  }
  0x52   : > { %1392 = vsyncadd (%p1776_p6), %s242_s23, 4294967168  ;;  %s251_s15 = scalar_lea.sflag [#allocation6], %s1604_s14  ;;  %s254_s17 = scalar_lea.vmem [#allocation5], %s1607_s16 }
  0x53   : > { %1394 = dma.done.wait (%p1776_p6), %s251_s15, 128  }
  0x54   : > { %1396 = vsyncadd (%p1776_p6), %s251_s15, 4294967168  ;;  %v1419_v0 = vmov 0.0   ;;  %vm1420_vm0 = vmmov 0   ;;  %vm299_vm1 = vcmask 261120   ;;  %v297_v1 = vld [vmem:[%s254_s17] sm:$0xff]  ;;  %v296_v2 = vld [vmem:[%s245_s8] sm:$0xff] }
  0x55   : > { %1170 = vmatprep.subr.mxu0 %v1419_v0  ;;  %1172 = vmatprep.mubr.msk.f32.mxu0 %vm1420_vm0, %v1419_v0  ;;  %vm377_vm2 = vcmask 64512   ;;  %v1421_v12 = vmov 0   ;;  %s1422_s29 = smov 96   ;;  %p290_p13 = scmp.lt.s32.totalorder %s1477_s22, 1  ;;  %v1647_v14 = vld [vmem:[%s1762_s3] sm:$0xff]  ;;  %vm1002_vm3 = vcmask 523264  }
  0x56   : > { %1175 = vmatprep.subr.mxu1 %v1419_v0  ;;  %1177 = vmatprep.mubr.msk.f32.mxu1 %vm1420_vm0, %v1419_v0  ;;  %s1423_s28 = smov 64   ;;  %s1424_s11 = smov 32   ;;  %v1658_v18 = vld [vmem:[%s1763_s4] sm:$0xff]  ;;  %vm1004_vm4 = vcmask 785408  }
  0x57   : > { %1171 = vmatpush3.xpose.msk.msra.mxu0 %vm299_vm1, %v297_v1  ;;  %1267 = vset.pattern.permute.xlu1 %v1421_v12  ;;  %s291_s10 = scalar_select %p290_p13, %s1477_s22, 1 }
  0x58   : > { %1185 = vmatprep.subr.mxu0 %v1419_v0  ;;  %1268 = vset.pattern.permute.xlu0 %v1421_v12  ;;  %s1151_s15 = sshll.u32 %s1477_s22, 7  ;;  %s289_s17 = scalar_lea.vmem [#allocation7], %s1607_s16 }
  0x59   : > { %s1137_s13 = sshll.u32 %s291_s10, 3  ;;  %s1021_s10 = sshll.u32 %s289_s17, 4  ;;  %s1717_s10 = int_to_ptr.vmem [resolvable:$true] %s1021_s10 }
  0x5a   : > { %1173 = vmatmul.mubr.msk.f32.vlgmr.msra.gmra.mrb[0].mxu0 %vm299_vm1, %v296_v2  ;;  %s293_s26 = scalar_lea.vmem %s1761_s2, %s1137_s13  ;;  %s1715_s25 = scalar_lea.hbm %s1764_s5, %s1151_s15 }
  0x5b   : > { %1187 = vmatprep.mubr.msk.f32.mxu0 %vm1420_vm0, %v1419_v0  ;;  %v1640_v13 = vld [vmem:[%s293_s26] sm:$0xff]  ;;  %s1008_s22 = scalar_lea.sflag [#allocation4], %s1604_s14  ;;  %s1345_s16 = scalar_lea.vmem %s1717_s10, 128 }
  0x5c   : > { %1176 = vmatpush3.msra.mxu1 %v1640_v13  ;;  %p1346_p3 = scmp.ne.s32.totalorder %s1717_s10, %s1345_s16  ;;  %p1777_p7 = scmp.ne.s32.totalorder %s1769_s30, 0 }
  0x5d   : > { %1180 = vmatprep.subr.mxu1 %v1419_v0 }
  0x5e   : > { %p1347_p5 = pnand %p1346_p3, %p1777_p7 }
  0x60   : > { %p1348_p8 = pneg %p1347_p5 }
 0x12d   : > { %v372_v3 = vpop.f32.mrb[0].mxu0 }
 0x12e   : > { %v376_v4 = vmul.f32 0.17677669, %v372_v3  ;;  %v1174_v5 = vpop.f32.mrb[1].mxu0 }
 0x130   : > { %v378_v6 = vsel %vm377_vm2, %v376_v4, -inf }
 0x131   : > { %379 = vmax.xlane.f32.xlu0 %v378_v6 }
 0x1be   : > { %v380_v7 = vpop.xlane.xlu0 %379 }
 0x1bf   : > { %v381_v8 = vsub.f32 %v376_v4, %v380_v7 }
 0x1c1   : > { %v382_v9 = vmul.f32 1.442695, %v381_v8 }
 0x1c3   : > { %1269 = vpow2.f32 %v382_v9 }
 0x1cd   : > { %v1270_v10 = vpop.eup %1269 }
 0x1ce   : > { %v384_v11 = vsel %vm377_vm2, %v1270_v10, 0.0 }
 0x1cf   : > { %385 = vadd.xlane.f32.xlu0 %v384_v11 }
 0x1e5   : > { %469 = vrot.lane.b32.xlu0 %v296_v2, %s1422_s29 }
 0x25c   : > { %v386_v15 = vpop.xlane.xlu0 %385 }
 0x25d   : > { %v387_v16 = vmul.f32 %v386_v15, %v1647_v14 }
 0x25f   : > { %1271 = vrcp.f32 %v387_v16 }
 0x260   : > { %v470_v23 = vpop.permute.xlu0 %469 }
 0x269   : > { %v1272_v17 = vpop.eup %1271 }
 0x26a   : > { %391 = vperm.xlu1 %1267, %v1272_v17  }
 0x26e   : > { %471 = vrot.lane.b32.xlu1 %v297_v1, %s1422_s29 }
 0x272   : > { %645 = vrot.lane.b32.xlu1 %v297_v1, %s1423_s28 }
 0x276   : > { %643 = vrot.lane.b32.xlu1 %v296_v2, %s1423_s28 }
 0x27a   : > { %818 = vrot.lane.b32.xlu1 %v297_v1, %s1424_s11 }
 0x27e   : > { %816 = vrot.lane.b32.xlu1 %v296_v2, %s1424_s11 }
 0x2e9   : > { %v392_v19 = vpop.permute.xlu1 %391 }
 0x2ea   : > { %v394_v20 = vmul.f32 %v1270_v10, %v392_v19 }
 0x2ec   : > { %v395_v21 = vadd.f32 %v394_v20, %v1658_v18 }
 0x2ed   : > { %v472_v22 = vpop.permute.xlu1 %471 }
 0x2ee   : > { %1178 = vmatmul.mubr.msk.f32.vlgmr.msra.gmra.mrb[0].mxu1 %vm377_vm2, %v395_v21 }
 0x2ef   : > { %1181 = vmatpush3.xpose.msk.msra.mxu1 %vm299_vm1, %v472_v22  ;;  %1182 = vmatprep.mubr.msk.f32.mxu1 %vm1420_vm0, %v1419_v0 }
 0x2f0   : > { %1190 = vmatprep.subr.mxu1 %v1419_v0 }
 0x2f1   : > { %v646_v24 = vpop.permute.xlu1 %645 }
 0x2f2   : > { %1183 = vmatmul.mubr.msk.f32.vlgmr.msra.gmra.mrb[2].mxu1 %vm299_vm1, %v470_v23 }
 0x2f3   : > { %1191 = vmatpush3.xpose.msk.msra.mxu1 %vm299_vm1, %v646_v24  ;;  %1192 = vmatprep.mubr.msk.f32.mxu1 %vm1420_vm0, %v1419_v0 }
 0x2f4   : > { %1200 = vmatprep.subr.mxu1 %v1419_v0 }
 0x2f5   : > { %v644_v25 = vpop.permute.xlu1 %643 }
 0x2f6   : > { %1193 = vmatmul.mubr.msk.f32.vlgmr.msra.gmra.mrb[4].mxu1 %vm299_vm1, %v644_v25 }
 0x2f7   : > { %1202 = vmatprep.mubr.msk.f32.mxu1 %vm1420_vm0, %v1419_v0 }
 0x2f9   : > { %v819_v26 = vpop.permute.xlu1 %818 }
 0x2fa   : > { %1201 = vmatpush3.xpose.msk.msra.mxu1 %vm299_vm1, %v819_v26 }
 0x2fd   : > { %v817_v27 = vpop.permute.xlu1 %816 }
 0x2fe   : > { %1203 = vmatmul.mubr.msk.f32.vlgmr.msra.gmra.mrb[6].mxu1 %vm299_vm1, %v817_v27 }
 0x3c1   : > { %v1676_v28 = vpop.f32.mrb[0].mxu1 }
 0x3c2   : > { %v1179_v29 = vpop.f32.mrb[1].mxu1 }
 0x3c5   : > { %v543_v30 = vpop.f32.mrb[2].mxu1 }
 0x3c6   : > { %v547_v31 = vmul.f32 0.17677669, %v543_v30  ;;  %v1184_v32 = vpop.f32.mrb[3].mxu1 }
 0x3c8   : > { %v548_v33 = vsel %vm377_vm2, %v547_v31, -inf }
 0x3c9   : > { %549 = vmax.xlane.f32.xlu1 %v548_v33  ;;  %v717_v34 = vpop.f32.mrb[4].mxu1 }
 0x3ca   : > { %v721_v35 = vmul.f32 0.17677669, %v717_v34  ;;  %v1194_v36 = vpop.f32.mrb[5].mxu1 }
 0x3cc   : > { %v722_v37 = vsel %vm377_vm2, %v721_v35, -inf }
 0x3cd   : > { %723 = vmax.xlane.f32.xlu0 %v722_v37 }
 0x3d1   : > { %v890_v38 = vpop.f32.mrb[6].mxu1 }
 0x3d2   : > { %v894_v39 = vmul.f32 0.17677669, %v890_v38  ;;  %v1204_v40 = vpop.f32.mrb[7].mxu1 }
 0x3d4   : > { %v895_v41 = vsel %vm377_vm2, %v894_v39, -inf }
 0x3d5   : > { %896 = vmax.xlane.f32.xlu1 %v895_v41 }
 0x456   : > { %v550_v42 = vpop.xlane.xlu1 %549 }
 0x457   : > { %v551_v43 = vsub.f32 %v547_v31, %v550_v42 }
 0x459   : > { %v552_v44 = vmul.f32 1.442695, %v551_v43 }
 0x45a   : > { %v724_v45 = vpop.xlane.xlu0 %723 }
 0x45b   : > { %1273 = vpow2.f32 %v552_v44  ;;  %v725_v46 = vsub.f32 %v721_v35, %v724_v45 }
 0x45d   : > { %v726_v47 = vmul.f32 1.442695, %v725_v46 }
 0x45f   : > { %1275 = vpow2.f32 %v726_v47 }
 0x462   : > { %v897_v48 = vpop.xlane.xlu1 %896 }
 0x463   : > { %v898_v49 = vsub.f32 %v894_v39, %v897_v48 }
 0x465   : > { %v1274_v50 = vpop.eup %1273  ;;  %v899_v51 = vmul.f32 1.442695, %v898_v49 }
 0x466   : > { %v554_v52 = vsel %vm377_vm2, %v1274_v50, 0.0 }
 0x467   : > { %1277 = vpow2.f32 %v899_v51  ;;  %555 = vadd.xlane.f32.xlu0 %v554_v52 }
 0x469   : > { %v1276_v53 = vpop.eup %1275 }
 0x46a   : > { %v728_v54 = vsel %vm377_vm2, %v1276_v53, 0.0 }
 0x46b   : > { %729 = vadd.xlane.f32.xlu1 %v728_v54 }
 0x471   : > { %v1278_v55 = vpop.eup %1277 }
 0x472   : > { %v901_v56 = vsel %vm377_vm2, %v1278_v55, 0.0 }
 0x473   : > { %902 = vadd.xlane.f32.xlu0 %v901_v56 }
 0x4f4   : > { %v556_v57 = vpop.xlane.xlu0 %555 }
 0x4f5   : > { %v557_v58 = vmul.f32 %v556_v57, %v1647_v14 }
 0x4f7   : > { %1279 = vrcp.f32 %v557_v58 }
 0x4f8   : > { %v730_v59 = vpop.xlane.xlu1 %729 }
 0x4f9   : > { %v731_v60 = vmul.f32 %v730_v59, %v1647_v14 }
 0x4fb   : > { %1281 = vrcp.f32 %v731_v60 }
 0x500   : > { %v903_v61 = vpop.xlane.xlu0 %902 }
 0x501   : > { %v1280_v62 = vpop.eup %1279  ;;  %v904_v63 = vmul.f32 %v903_v61, %v1647_v14 }
 0x502   : > { %561 = vperm.xlu1 %1267, %v1280_v62  }
 0x503   : > { %1283 = vrcp.f32 %v904_v63 }
 0x505   : > { %v1282_v1 = vpop.eup %1281 }
 0x506   : > { %735 = vperm.xlu0 %1268, %v1282_v1  }
 0x50d   : > { %v1284_v2 = vpop.eup %1283 }
 0x50e   : > { %908 = vperm.xlu1 %1267, %v1284_v2  }
 0x512   : > { %567 = vrot.lane.b32.xlu1 %v1640_v13, %s1422_s29 }
 0x516   : > { %740 = vrot.lane.b32.xlu1 %v1640_v13, %s1423_s28 }
 0x51a   : > { %913 = vrot.lane.b32.xlu1 %v1640_v13, %s1424_s11 }
 0x581   : > { %v562_v3 = vpop.permute.xlu1 %561 }
 0x582   : > { %v564_v4 = vmul.f32 %v1274_v50, %v562_v3 }
 0x584   : > { %v565_v7 = vadd.f32 %v564_v4, %v1658_v18 }
 0x585   : > { %v736_v6 = vpop.permute.xlu0 %735 }
 0x586   : > { %v738_v8 = vmul.f32 %v1276_v53, %v736_v6 }
 0x588   : > { %v739_v10 = vadd.f32 %v738_v8, %v1658_v18 }
 0x58d   : > { %v909_v5 = vpop.permute.xlu1 %908 }
 0x58e   : > { %v911_v11 = vmul.f32 %v1278_v55, %v909_v5 }
 0x590   : > { %v912_v13 = vadd.f32 %v911_v11, %v1658_v18 }
 0x591   : > { %v568_v9 = vpop.permute.xlu1 %567 }
 0x592   : > { %1186 = vmatpush3.msra.mxu0 %v568_v9 }
 0x593   : > { %1188 = vmatmul.mubr.msk.f32.vlgmr.msra.gmra.mrb[2].mxu0 %vm377_vm2, %v565_v7  ;;  %1195 = vmatprep.subr.mxu0 %v1419_v0 }
 0x594   : > { %1197 = vmatprep.mubr.msk.f32.mxu0 %vm1420_vm0, %v1419_v0 }
 0x595   : > { %v741_v12 = vpop.permute.xlu1 %740 }
 0x596   : > { %1196 = vmatpush3.msra.mxu0 %v741_v12 }
 0x597   : > { %1198 = vmatmul.mubr.msk.f32.vlgmr.msra.gmra.mrb[4].mxu0 %vm377_vm2, %v739_v10  ;;  %1205 = vmatprep.subr.mxu0 %v1419_v0 }
 0x598   : > { %1207 = vmatprep.mubr.msk.f32.mxu0 %vm1420_vm0, %v1419_v0 }
 0x599   : > { %v914_v14 = vpop.permute.xlu1 %913 }
 0x59a   : > { %1206 = vmatpush3.msra.mxu0 %v914_v14 }
 0x59b   : > { %1208 = vmatmul.mubr.msk.f32.vlgmr.msra.gmra.mrb[6].mxu0 %vm377_vm2, %v912_v13 }
 0x666   : > { %v639_v15 = vpop.f32.mrb[2].mxu0 }
 0x667   : > { %990 = vrot.lane.b32.xlu1 %v639_v15, %s1424_s11  ;;  %v1189_v16 = vpop.f32.mrb[3].mxu0 }
 0x66a   : > { %v812_v17 = vpop.f32.mrb[4].mxu0 }
 0x66b   : > { %994 = vrot.lane.b32.xlu1 %v812_v17, %s1423_s28  ;;  %v1199_v19 = vpop.f32.mrb[5].mxu0 }
 0x66e   : > { %v985_v20 = vpop.f32.mrb[6].mxu0 }
 0x66f   : > { %998 = vrot.lane.b32.xlu1 %v985_v20, %s1422_s29  ;;  %v1209_v0 = vpop.f32.mrb[7].mxu0  ;;  %s1425_s29 = smov [#allocation7]  }
 0x670   : > { %s1349_s26 = sshll.u32 %s1425_s29, 4  ;;  %s1350_s26 = int_to_ptr.vmem [resolvable:$false] %s1349_s26 }
 0x671   : > { %s1351_s7 = scalar_lea.vmem %s1350_s26, 256  ;;  %p1352_p9 = scmp.lt.s32.totalorder %s1717_s10, %s1350_s26 }
 0x672   : > { %p1353_p0 = scmp.lt.s32.totalorder %s1351_s7, %s1345_s16 }
 0x674   : > { %p1354_p1 = por %p1353_p0, %p1352_p9 }
 0x676   : > { %p1355_p11 = pnand %p1354_p1, %p1348_p8 }
 0x6d9   : > { %v991_v18 = vpop.permute.xlu1 %990 }
 0x6da   : > { %v1001_v22 = vsel %vm299_vm1, %v1676_v28, %v991_v18 }
 0x6dd   : > { %v995_v21 = vpop.permute.xlu1 %994 }
 0x6de   : > { %v1003_v23 = vsel %vm1002_vm3, %v1001_v22, %v995_v21 }
 0x6e1   : > { %v999_v24 = vpop.permute.xlu1 %998 }
 0x6e2   : > { %v1005_v25 = vsel %vm1004_vm4, %v1003_v23, %v999_v24 }
 0x6e3   : > { %1006 = vst [vmem:[%s289_s17] sm:$0xff] %v1005_v25 }
 0x6e4   : > { %1358 = shalt.err (!%p1355_p11)
}
 0x6e5   : > { %s1359_s14 = scalar_lea.hbm %s1715_s25, 128  ;;  %s1363_s11 = scalar_lea.hbm %s1764_s5, 256 }
 0x6e6   : > { %p1360_p12 = scmp.ne.s32.totalorder %s1715_s25, %s1359_s14  ;;  %p1364_p10 = scmp.lt.u32.totalorder %s1715_s25, %s1764_s5 }
 0x6e7   : > { %p1365_p6 = scmp.lt.u32.totalorder %s1363_s11, %s1359_s14  ;;  %p1367_p3 = scmp.lt.u32.totalorder %s1359_s14, %s1715_s25 }
 0x6e8   : > { %p1361_p2 = pnand %p1360_p12, %p1777_p7 }
 0x6e9   : > { %p1366_p13 = por %p1365_p6, %p1364_p10 }
 0x6ea   : > { %p1362_p4 = pneg %p1361_p2 }
 0x6eb   : > { %p1368_p5 = por %p1367_p3, %p1366_p13 }
 0x6ed   : > { %p1369_p8 = pnand %p1368_p5, %p1362_p4 }
 0x6ef   : > { %1372 = shalt.err (!%p1369_p8)
}
 0x6f0   : > { %1214 = dma.vmem_to_hbm [thread:$0]  (%p1777_p7), %s1717_s10, 128, %s1715_s25, %s1008_s22  }
 0x6f1 PF: > { %s1033_s15 = sand.u32 1, %s1403_s18   ;;  %p1778_p9 = scmp.ne.s32.totalorder %s1770_s6, 0 }
 0x6f2   : > { %p1779_p0 = scmp.ge.s32.totalorder %s1415_s21, 2  ;;  %s1034_s17 = scalar_lea.sflag [#allocation4], %s1033_s15 }
 0x6f4   : > { %p1224_p1 = pnand %p1779_p0, %p1778_p9 }
 0x6f6   : > { %1398 = dma.done.wait (!%p1224_p1), %s1034_s17, 128  }
 0x6f7   : > { %1400 = vsyncadd (!%p1224_p1), %s1034_s17, 4294967168  ;;  %p21_p11 = scmp.ge.s32.totalorder %s1481_s24, 4   ;;  %s1780_s18 = smov %s1407_s19 }
 0x6f8   : > { %s1781_s19 = smov %s1411_s20  ;;  %s1782_s20 = smov %s1493_s27 }
 0x6f9   : > { %s1783_s21 = smov %s1481_s24  ;;  %23 = sbr.rel (!%p21_p11) target bundleno = 7 (0x7), region = 101 }
 0x700   :  { %1039 = vsyncpa [#allocation3], 1 }
 0x701   :  { %1041 = vsyncpa [#allocation3 + $0x1], 1 }
 0x702   :  { %1042 = vsyncpa [#allocation6], 1 }
 0x703   :  { %1044 = vsyncpa [#allocation6 + $0x1], 1 }
 0x704   :  { %1045 = vsyncpa [#allocation4], 1 }
 0x705   :  { %1047 = vsyncpa [#allocation4 + $0x1], 1 }

</bundles_post_ra>
